<compile_context>
chip_gen: v7x
topology: tpu7x:2x2x1
jax: 0.10.0
libtpu: 0.0.40
codegen_flags: <defaults>
</compile_context>

<pallas_src>
import functools

import jax
import jax.numpy as jnp
from jax.experimental import pallas as pl
from jax.experimental.pallas import tpu as pltpu


def gated_transition_kernel(
    z_ref,                      # [TB, z_dim]
    w1_ref, b1_ref,             # [z_dim, 2T], [1, 2T]      (fused Wg1|Wp1)
    w2_ref, b2_ref,             # [2T, 2z],    [1, 2z]      (blockdiag Wg2, Wp2)
    w3_ref, b3_ref,             # [2z, 2z],    [1, 2z]      (blockdiag Wloc, Wsig)
    out_ref,                    # [TB, 2z]  = [loc | scale]
    x3_buf,                     # VMEM scratch [TB, 2z]
    *, z_dim,
):
    z = z_ref[...]

    # Stage 1: H = relu(z @ [Wg1 | Wp1] + [bg1 | bp1])          -> [TB, 2T]
    h = jnp.dot(z, w1_ref[...], preferred_element_type=jnp.float32) + b1_ref[...]
    h = jnp.maximum(h, 0.0)

    # Stage 2: G = H @ blockdiag(Wg2, Wp2) + [bg2 | bp2]        -> [TB, 2z]
    g = jnp.dot(h, w2_ref[...], preferred_element_type=jnp.float32) + b2_ref[...]
    gate = jax.nn.sigmoid(g[:, :z_dim])          # sigmoid(lin_gate_hidden_to_z(_gate))
    proposed_mean = g[:, z_dim:]                 # lin_proposed_mean_hidden_to_z(_proposed_mean)

    # Stage 3: Y = [z | relu(pm)] @ blockdiag(Wloc, Wsig) + [bloc | bsig]
    # (build the lane-concatenated input in a VMEM scratch via two masked sub-stores)
    x3_buf[:, :z_dim] = z
    x3_buf[:, z_dim:] = jnp.maximum(proposed_mean, 0.0)
    y = jnp.dot(x3_buf[...], w3_ref[...], preferred_element_type=jnp.float32) + b3_ref[...]

    z_loc = y[:, :z_dim]                         # lin_z_to_loc(z)
    loc = (1.0 - gate) * z_loc + gate * proposed_mean
    scale = jnp.exp(y[:, z_dim:])                # exp(lin_sig(relu(proposed_mean)))

    # Single lane-concatenated output slab: [loc | scale]
    out_ref[:, :z_dim] = loc.astype(out_ref.dtype)
    out_ref[:, z_dim:] = scale.astype(out_ref.dtype)


def _fuse_params(p):
    """One-time fusion of the six linears into three wider weights (done in plain JAX)."""
    z_dim = p["wloc"].shape[0]
    t_dim = p["wg1"].shape[1]
    dt = p["wg1"].dtype

    w1 = jnp.concatenate([p["wg1"], p["wp1"]], axis=1)                 # [z, 2T]
    b1 = jnp.concatenate([p["bg1"], p["bp1"]], axis=1)                 # [1, 2T]

    zer_tz = jnp.zeros((t_dim, z_dim), dt)
    w2 = jnp.block([[p["wg2"], zer_tz], [zer_tz, p["wp2"]]])           # [2T, 2z]
    b2 = jnp.concatenate([p["bg2"], p["bp2"]], axis=1)                 # [1, 2z]

    zer_zz = jnp.zeros((z_dim, z_dim), dt)
    w3 = jnp.block([[p["wloc"], zer_zz], [zer_zz, p["wsig"]]])         # [2z, 2z]
    b3 = jnp.concatenate([p["bloc"], p["bsig"]], axis=1)               # [1, 2z]

    return w1, b1, w2, b2, w3, b3


def gated_transition(z_t_1, params, *, block_b=None):
    """Returns (loc, scale), each [B, z_dim]. `params` holds per-layer (W[in,out], b[1,out])."""
    B, z_dim = z_t_1.shape
    w1, b1, w2, b2, w3, b3 = _fuse_params(params)

    # Batch tiling: keep tiles big (good DMA / MXU utilization) but respect the
    # (8, 128) sublane constraint: block rows must be a multiple of 8 or equal B.
    if block_b is None:
        block_b = min(B, 512)
    if block_b != B and block_b % 8 != 0:
        block_b = B
    grid = (pl.cdiv(B, block_b),)

    def const_spec(a):
        # Full array, same block on every grid step -> weights stay resident in VMEM.
        return pl.BlockSpec(a.shape, lambda i: (0,) * a.ndim)

    kernel = functools.partial(gated_transition_kernel, z_dim=z_dim)

    out = pl.pallas_call(
        kernel,
        out_shape=jax.ShapeDtypeStruct((B, 2 * z_dim), jnp.float32),
        grid=grid,
        in_specs=[
            pl.BlockSpec((block_b, z_dim), lambda i: (i, 0)),
            const_spec(w1), const_spec(b1),
            const_spec(w2), const_spec(b2),
            const_spec(w3), const_spec(b3),
        ],
        out_specs=pl.BlockSpec((block_b, 2 * z_dim), lambda i: (i, 0)),
        scratch_shapes=[pltpu.VMEM((block_b, 2 * z_dim), jnp.float32)],
        compiler_params=pltpu.CompilerParams(
            dimension_semantics=("parallel",),   # batch tiles are independent (megacore)
        ),
    )(z_t_1, w1, b1, w2, b2, w3, b3)

    return out[:, :z_dim], out[:, z_dim:]


def init_params(key, z_dim, transition_dim):
    """Deterministic init. Weights stored as [in, out] (i.e. PyTorch W^T)."""
    ks = jax.random.split(key, 10)

    def linear(kw, kb, fan_in, fan_out):
        # PyTorch nn.Linear default: U(-1/sqrt(fan_in), 1/sqrt(fan_in))
        bound = 1.0 / jnp.sqrt(fan_in)
        w = jax.random.uniform(kw, (fan_in, fan_out), jnp.float32, -bound, bound)
        b = jax.random.uniform(kb, (1, fan_out), jnp.float32, -bound, bound)
        return w, b

    wg1, bg1 = linear(ks[0], ks[1], z_dim, transition_dim)
    wg2, bg2 = linear(ks[2], ks[3], transition_dim, z_dim)
    wp1, bp1 = linear(ks[4], ks[5], z_dim, transition_dim)
    wp2, bp2 = linear(ks[6], ks[7], transition_dim, z_dim)
    wsig, bsig = linear(ks[8], ks[9], z_dim, z_dim)
    # lin_z_to_loc: weight = eye(z_dim), bias = zeros  (as in the module __init__).
    # Kept as a real (fused) matmul since the layer is trainable in general.
    wloc = jnp.eye(z_dim, dtype=jnp.float32)
    bloc = jnp.zeros((1, z_dim), dtype=jnp.float32)

    return dict(
        wg1=wg1, bg1=bg1, wg2=wg2, bg2=bg2,
        wp1=wp1, bp1=bp1, wp2=wp2, bp2=bp2,
        wsig=wsig, bsig=bsig, wloc=wloc, bloc=bloc,
    )


def reference(z, p):
    """Plain-JAX reference (mirrors the PyTorch forward, unfused)."""
    relu = lambda x: jnp.maximum(x, 0.0)
    _gate = relu(z @ p["wg1"] + p["bg1"])
    gate = jax.nn.sigmoid(_gate @ p["wg2"] + p["bg2"])
    _pm = relu(z @ p["wp1"] + p["bp1"])
    pm = _pm @ p["wp2"] + p["bp2"]
    loc = (1.0 - gate) * (z @ p["wloc"] + p["bloc"]) + gate * pm
    scale = jnp.exp(relu(pm) @ p["wsig"] + p["bsig"])
    return loc, scale


if __name__ == "__main__":
    key = jax.random.PRNGKey(0)
    k_in, k_par = jax.random.split(key)

    batch, z_dim, transition_dim = 8, 32, 64
    z_t_1 = jax.random.normal(k_in, (batch, z_dim), jnp.float32)
    params = init_params(k_par, z_dim, transition_dim)

    loc, scale = gated_transition(z_t_1, params)
    jax.block_until_ready((loc, scale))

    loc_ref, scale_ref = reference(z_t_1, params)
    assert jnp.allclose(loc, loc_ref, atol=1e-5, rtol=1e-5), "loc mismatch"
    assert jnp.allclose(scale, scale_ref, atol=1e-5, rtol=1e-5), "scale mismatch"

    print("KERNEL_OK")
</pallas_src>

<mosaic_0001>
module attributes {stable_mosaic.version = 11 : i64} {
  func.func @gated_transition_kernel(%arg0: i32, %arg1: memref<8x32xf32, #tpu.memory_space<vmem>>, %arg2: memref<32x128xf32, #tpu.memory_space<vmem>>, %arg3: memref<1x128xf32, #tpu.memory_space<vmem>>, %arg4: memref<128x64xf32, #tpu.memory_space<vmem>>, %arg5: memref<1x64xf32, #tpu.memory_space<vmem>>, %arg6: memref<64x64xf32, #tpu.memory_space<vmem>>, %arg7: memref<1x64xf32, #tpu.memory_space<vmem>>, %arg8: memref<8x64xf32, #tpu.memory_space<vmem>>, %arg9: memref<8x64xf32, #tpu.memory_space<vmem>>) attributes {dimension_semantics = [#tpu.dimension_semantics<parallel>], iteration_bounds = array<i64: 1>, scalar_prefetch = 0 : i64, scratch_operands = 1 : i64, tpu.core_type = #tpu.core_type<tc>, window_params = [{transform_indices = @transform_0, window_bounds = array<i64: 8, 32>}, {pipeline_mode = #tpu.pipeline_mode<synchronous>, transform_indices = @transform_1, window_bounds = array<i64: 32, 128>}, {pipeline_mode = #tpu.pipeline_mode<synchronous>, transform_indices = @transform_2, window_bounds = array<i64: 1, 128>}, {pipeline_mode = #tpu.pipeline_mode<synchronous>, transform_indices = @transform_3, window_bounds = array<i64: 128, 64>}, {pipeline_mode = #tpu.pipeline_mode<synchronous>, transform_indices = @transform_4, window_bounds = array<i64: 1, 64>}, {pipeline_mode = #tpu.pipeline_mode<synchronous>, transform_indices = @transform_5, window_bounds = array<i64: 64, 64>}, {pipeline_mode = #tpu.pipeline_mode<synchronous>, transform_indices = @transform_6, window_bounds = array<i64: 1, 64>}, {transform_indices = @transform_7, window_bounds = array<i64: 8, 64>}]} {
    %c0 = arith.constant 0 : index
    %c0_0 = arith.constant 0 : index
    %0 = vector.load %arg1[%c0, %c0_0] : memref<8x32xf32, #tpu.memory_space<vmem>>, vector<8x32xf32>
    %c0_1 = arith.constant 0 : index
    %c0_2 = arith.constant 0 : index
    %1 = vector.load %arg2[%c0_1, %c0_2] : memref<32x128xf32, #tpu.memory_space<vmem>>, vector<32x128xf32>
    %cst = arith.constant dense<0.000000e+00> : vector<8x128xf32>
    %2 = tpu.matmul %0, %1, %cst {dimension_numbers = #tpu.dot_dimension_numbers<[1], [0], [0], [1], [0, 0, 1, 1], [], []>} : vector<8x32xf32>, vector<32x128xf32>, vector<8x128xf32> -> vector<8x128xf32>
    %c0_3 = arith.constant 0 : index
    %c0_4 = arith.constant 0 : index
    %3 = vector.load %arg3[%c0_3, %c0_4] : memref<1x128xf32, #tpu.memory_space<vmem>>, vector<1x128xf32>
    %4 = vector.broadcast %3 : vector<1x128xf32> to vector<8x128xf32>
    %5 = arith.addf %2, %4 : vector<8x128xf32>
    %cst_5 = arith.constant 0.000000e+00 : f32
    %6 = vector.broadcast %cst_5 : f32 to vector<8x128xf32>
    %7 = arith.maximumf %5, %6 : vector<8x128xf32>
    %c0_6 = arith.constant 0 : index
    %c0_7 = arith.constant 0 : index
    %8 = vector.load %arg4[%c0_6, %c0_7] : memref<128x64xf32, #tpu.memory_space<vmem>>, vector<128x64xf32>
    %cst_8 = arith.constant dense<0.000000e+00> : vector<8x64xf32>
    %9 = tpu.matmul %7, %8, %cst_8 {dimension_numbers = #tpu.dot_dimension_numbers<[1], [0], [0], [1], [0, 0, 1, 1], [], []>} : vector<8x128xf32>, vector<128x64xf32>, vector<8x64xf32> -> vector<8x64xf32>
    %c0_9 = arith.constant 0 : index
    %c0_10 = arith.constant 0 : index
    %10 = vector.load %arg5[%c0_9, %c0_10] : memref<1x64xf32, #tpu.memory_space<vmem>>, vector<1x64xf32>
    %11 = vector.broadcast %10 : vector<1x64xf32> to vector<8x64xf32>
    %12 = arith.addf %9, %11 : vector<8x64xf32>
    %13 = vector.extract_strided_slice %12 {offsets = [0, 0], sizes = [8, 32], strides = [1, 1]} : vector<8x64xf32> to vector<8x32xf32>
    %14 = arith.negf %13 : vector<8x32xf32>
    %15 = math.exp %14 : vector<8x32xf32>
    %cst_11 = arith.constant 1.000000e+00 : f32
    %16 = vector.broadcast %cst_11 : f32 to vector<8x32xf32>
    %17 = arith.addf %16, %15 : vector<8x32xf32>
    %18 = arith.divf %16, %17 : vector<8x32xf32>
    %19 = vector.extract_strided_slice %12 {offsets = [0, 32], sizes = [8, 32], strides = [1, 1]} : vector<8x64xf32> to vector<8x32xf32>
    %c0_12 = arith.constant 0 : index
    %c0_13 = arith.constant 0 : index
    %20 = vector.load %arg9[%c0_12, %c0_13] : memref<8x64xf32, #tpu.memory_space<vmem>>, vector<8x32xf32>
    tpu.vector_store %arg9[%c0_12, %c0_13], %0 {strides = array<i32>} : memref<8x64xf32, #tpu.memory_space<vmem>>, vector<8x32xf32>,
    %cst_14 = arith.constant 0.000000e+00 : f32
    %21 = vector.broadcast %cst_14 : f32 to vector<8x32xf32>
    %22 = arith.maximumf %19, %21 : vector<8x32xf32>
    %c0_15 = arith.constant 0 : index
    %c32 = arith.constant 32 : index
    %23 = vector.load %arg9[%c0_15, %c32] : memref<8x64xf32, #tpu.memory_space<vmem>>, vector<8x32xf32>
    tpu.vector_store %arg9[%c0_15, %c32], %22 {strides = array<i32>} : memref<8x64xf32, #tpu.memory_space<vmem>>, vector<8x32xf32>,
    %c0_16 = arith.constant 0 : index
    %c0_17 = arith.constant 0 : index
    %24 = vector.load %arg9[%c0_16, %c0_17] : memref<8x64xf32, #tpu.memory_space<vmem>>, vector<8x64xf32>
    %c0_18 = arith.constant 0 : index
    %c0_19 = arith.constant 0 : index
    %25 = vector.load %arg6[%c0_18, %c0_19] : memref<64x64xf32, #tpu.memory_space<vmem>>, vector<64x64xf32>
    %cst_20 = arith.constant dense<0.000000e+00> : vector<8x64xf32>
    %26 = tpu.matmul %24, %25, %cst_20 {dimension_numbers = #tpu.dot_dimension_numbers<[1], [0], [0], [1], [0, 0, 1, 1], [], []>} : vector<8x64xf32>, vector<64x64xf32>, vector<8x64xf32> -> vector<8x64xf32>
    %c0_21 = arith.constant 0 : index
    %c0_22 = arith.constant 0 : index
    %27 = vector.load %arg7[%c0_21, %c0_22] : memref<1x64xf32, #tpu.memory_space<vmem>>, vector<1x64xf32>
    %28 = vector.broadcast %27 : vector<1x64xf32> to vector<8x64xf32>
    %29 = arith.addf %26, %28 : vector<8x64xf32>
    %30 = vector.extract_strided_slice %29 {offsets = [0, 0], sizes = [8, 32], strides = [1, 1]} : vector<8x64xf32> to vector<8x32xf32>
    %cst_23 = arith.constant 1.000000e+00 : f32
    %31 = vector.broadcast %cst_23 : f32 to vector<8x32xf32>
    %32 = arith.subf %31, %18 : vector<8x32xf32>
    %33 = arith.mulf %32, %30 : vector<8x32xf32>
    %34 = arith.mulf %18, %19 : vector<8x32xf32>
    %35 = arith.addf %33, %34 : vector<8x32xf32>
    %36 = vector.extract_strided_slice %29 {offsets = [0, 32], sizes = [8, 32], strides = [1, 1]} : vector<8x64xf32> to vector<8x32xf32>
    %37 = math.exp %36 : vector<8x32xf32>
    %c0_24 = arith.constant 0 : index
    %c0_25 = arith.constant 0 : index
    %38 = vector.load %arg8[%c0_24, %c0_25] : memref<8x64xf32, #tpu.memory_space<vmem>>, vector<8x32xf32>
    tpu.vector_store %arg8[%c0_24, %c0_25], %35 {strides = array<i32>} : memref<8x64xf32, #tpu.memory_space<vmem>>, vector<8x32xf32>,
    %c0_26 = arith.constant 0 : index
    %c32_27 = arith.constant 32 : index
    %39 = vector.load %arg8[%c0_26, %c32_27] : memref<8x64xf32, #tpu.memory_space<vmem>>, vector<8x32xf32>
    tpu.vector_store %arg8[%c0_26, %c32_27], %37 {strides = array<i32>} : memref<8x64xf32, #tpu.memory_space<vmem>>, vector<8x32xf32>,
    return
  }
  func.func @transform_0(%arg0: i32) -> (i32, i32) {
    %c0_i32 = arith.constant 0 : i32
    %c0_i32_0 = arith.constant 0 : i32
    return %arg0, %c0_i32 : i32, i32
  }
  func.func @transform_1(%arg0: i32) -> (i32, i32) {
    %c0_i32 = arith.constant 0 : i32
    %c0_i32_0 = arith.constant 0 : i32
    %c0_i32_1 = arith.constant 0 : i32
    return %c0_i32, %c0_i32_0 : i32, i32
  }
  func.func @transform_2(%arg0: i32) -> (i32, i32) {
    %c0_i32 = arith.constant 0 : i32
    %c0_i32_0 = arith.constant 0 : i32
    %c0_i32_1 = arith.constant 0 : i32
    return %c0_i32, %c0_i32_0 : i32, i32
  }
  func.func @transform_3(%arg0: i32) -> (i32, i32) {
    %c0_i32 = arith.constant 0 : i32
    %c0_i32_0 = arith.constant 0 : i32
    %c0_i32_1 = arith.constant 0 : i32
    return %c0_i32, %c0_i32_0 : i32, i32
  }
  func.func @transform_4(%arg0: i32) -> (i32, i32) {
    %c0_i32 = arith.constant 0 : i32
    %c0_i32_0 = arith.constant 0 : i32
    %c0_i32_1 = arith.constant 0 : i32
    return %c0_i32, %c0_i32_0 : i32, i32
  }
  func.func @transform_5(%arg0: i32) -> (i32, i32) {
    %c0_i32 = arith.constant 0 : i32
    %c0_i32_0 = arith.constant 0 : i32
    %c0_i32_1 = arith.constant 0 : i32
    return %c0_i32, %c0_i32_0 : i32, i32
  }
  func.func @transform_6(%arg0: i32) -> (i32, i32) {
    %c0_i32 = arith.constant 0 : i32
    %c0_i32_0 = arith.constant 0 : i32
    %c0_i32_1 = arith.constant 0 : i32
    return %c0_i32, %c0_i32_0 : i32, i32
  }
  func.func @transform_7(%arg0: i32) -> (i32, i32) {
    %c0_i32 = arith.constant 0 : i32
    %c0_i32_0 = arith.constant 0 : i32
    return %arg0, %c0_i32 : i32, i32
  }
}

</mosaic_0001>

<bundles_post_ra>
// kernel: tpu_custom_call.1
= control target key start
LH: loop header
LB: loop body
LE: loop exit
PB: predicated region body
PF: predicated region fallthrough
CT: control target
= control target key end

     0   :  { %v512_v3 = vmov 0.0|0.0   ;;  %vm513_vm0 = vmmov 0   ;;  %v514_v6 = vmov 0.0   ;;  %vm39_vm1 = vcmask 261120   ;;  %s687_s0 = inlined_call_operand.vmem [shape: f32[8,32], index: 0, kind: input, shape index: {}]   ;;  %s688_s1 = inlined_call_operand.vmem [shape: f32[32,128], index: 1, kind: input, shape index: {}]   ;;  %s689_s2 = inlined_call_operand.vmem [shape: f32[1,128], index: 2, kind: input, shape index: {}]   ;;  %s690_s3 = inlined_call_operand.vmem [shape: f32[128,64], index: 3, kind: input, shape index: {}]   ;;  %s691_s4 = inlined_call_operand.vmem [shape: f32[1,64], index: 4, kind: input, shape index: {}]   ;;  %s692_s5 = inlined_call_operand.vmem [shape: f32[64,64], index: 5, kind: input, shape index: {}]   ;;  %s693_s6 = inlined_call_operand.vmem [shape: f32[1,64], index: 6, kind: input, shape index: {}]   ;;  %s694_s7 = inlined_call_operand.hbm [shape: f32[8,64], index: 7, kind: output, shape index: {}]  }
   0x1   :  { %v28_v0 = vld [vmem:[%s688_s1] sm:$0xff]  ;;  %v29_v1 = vld [vmem:[%s688_s1 + $0x8] sm:$0xff]  ;;  %v30_v2 = vld [vmem:[%s688_s1 + $0x10] sm:$0xff]  ;;  %435 = vmatprep.subr.bf16.mxu0 %v512_v3  ;;  %378 = vmatprep.mubr.msk.f32.mxu0 %vm513_vm0, %v514_v6 }
   0x2   :  { %v436_v4 = vpack.c.bf16 %v29_v1, %v28_v0  ;;  %v31_v5 = vld [vmem:[%s688_s1 + $0x18] sm:$0xff]  ;;  %v27_v7 = vld [vmem:[%s687_s0] sm:$0xff]  ;;  %441 = vmatprep.subr.bf16.mxu1 %v512_v3  ;;  %v115_v9 = vld [vmem:[%s690_s3 + $0x8] sm:$0xff]  ;;  %413 = vmatprep.mubr.msk.f32.mxu1 %vm513_vm0, %v514_v6 }
   0x3   :  { %v114_v8 = vld [vmem:[%s690_s3] sm:$0xff]  ;;  %213 = vst.msk [vmem:[#allocation2] sm:$0xff] %vm39_vm1, %v27_v7  ;;  %v116_v10 = vld [vmem:[%s690_s3 + $0x10] sm:$0xff]  ;;  %v117_v11 = vld [vmem:[%s690_s3 + $0x18] sm:$0xff]  ;;  %v439_v12 = vpack.c.bf16 %v31_v5, %v30_v2 }
   0x4   :  { %437 = vmatpush3.bf16.msra.mxu0 %v436_v4  ;;  %v442_v13 = vpack.c.bf16 %v115_v9, %v114_v8  ;;  %v445_v14 = vpack.c.bf16 %v117_v11, %v116_v10  ;;  %v118_v15 = vld [vmem:[%s690_s3 + $0x20] sm:$0xff]  ;;  %v119_v16 = vld [vmem:[%s690_s3 + $0x28] sm:$0xff] }
   0x5   :  { %438 = vmatprep.subr.bf16.mxu0 %v512_v3 }
   0x6   :  { %443 = vmatpush3.bf16.msra.mxu1 %v442_v13 }
   0x7   :  { %444 = vmatprep.subr.bf16.mxu1 %v512_v3 }
   0x8   :  { %12 = vsyncpa [#allocation4], 0  ;;  %440 = vmatpush3.bf16.msra.mxu0 %v439_v12  ;;  %v448_v17 = vpack.c.bf16 %v119_v16, %v118_v15  ;;  %v120_v18 = vld [vmem:[%s690_s3 + $0x30] sm:$0xff]  ;;  %v121_v19 = vld [vmem:[%s690_s3 + $0x38] sm:$0xff]  ;;  %vm215_vm2 = vcmask 523520   ;;  %s515_s11 = smov 96  }
   0x9   :  { %465 = vmatprep.subr.bf16.mxu0 %v512_v3  ;;  %v451_v20 = vpack.c.bf16 %v121_v19, %v120_v18  ;;  %v122_v21 = vld [vmem:[%s690_s3 + $0x40] sm:$0xff]  ;;  %v123_v22 = vld [vmem:[%s690_s3 + $0x48] sm:$0xff]  ;;  %v124_v24 = vld [vmem:[%s690_s3 + $0x50] sm:$0xff]  ;;  %vm233_vm3 = vcmask 523264   ;;  %s516_s12 = smov [#allocation3]  }
   0xa   :  { %446 = vmatpush3.bf16.msra.mxu1 %v445_v14  ;;  %v454_v23 = vpack.c.bf16 %v123_v22, %v122_v21  ;;  %v125_v25 = vld [vmem:[%s690_s3 + $0x58] sm:$0xff]  ;;  %v126_v27 = vld [vmem:[%s690_s3 + $0x60] sm:$0xff]  ;;  %v127_v28 = vld [vmem:[%s690_s3 + $0x68] sm:$0xff]  ;;  %s325_s13 = sshll.u32 %s516_s12, 4  ;;  %s326_s13 = int_to_ptr.vmem [resolvable:$true] %s325_s13 }
   0xb   :  { %379 = vmatmul.mubr.msk.f32.vlgmr.msra.gmra.mrb[0].mxu0 %vm39_vm1, %v27_v7  ;;  %447 = vmatprep.subr.bf16.mxu1 %v512_v3  ;;  %v457_v26 = vpack.c.bf16 %v125_v25, %v124_v24  ;;  %v460_v29 = vpack.c.bf16 %v127_v28, %v126_v27  ;;  %v128_v30 = vld [vmem:[%s690_s3 + $0x70] sm:$0xff]  ;;  %v129_v31 = vld [vmem:[%s690_s3 + $0x78] sm:$0xff]  ;;  %v218_v33 = vld [vmem:[%s692_s5] sm:$0xff]  ;;  %s488_s14 = scalar_lea.vmem %s326_s13, 128  ;;  %p493_p1 = scmp.lt.s32.totalorder %s326_s13, %s326_s13 }
   0xc   :  { %432 = vmatprep.mubr.msk.f32.mxu0 %vm513_vm0, %v514_v6  ;;  %v463_v32 = vpack.c.bf16 %v129_v31, %v128_v30  ;;  %v219_v34 = vld [vmem:[%s692_s5 + $0x8] sm:$0xff]  ;;  %v333_v36 = vld [vmem:[%s689_s2] ss:$0 sm:$0xff]  ;;  %v220_v41 = vld [vmem:[%s692_s5 + $0x10] sm:$0xff]  ;;  %p489_p0 = scmp.ne.s32.totalorder %s326_s13, %s488_s14  ;;  %p494_p2 = scmp.lt.s32.totalorder %s488_s14, %s488_s14 }
   0xd   :  { %v466_v35 = vpack.c.bf16 %v219_v34, %v218_v33  ;;  %v221_v42 = vld [vmem:[%s692_s5 + $0x18] sm:$0xff]  ;;  %v222_v44 = vld [vmem:[%s692_s5 + $0x20] sm:$0xff]  ;;  %v223_v45 = vld [vmem:[%s692_s5 + $0x28] sm:$0xff] }
   0xe   :  { %449 = vmatpush3.bf16.msra.mxu1 %v448_v17  ;;  %v469_v43 = vpack.c.bf16 %v221_v42, %v220_v41  ;;  %v472_v46 = vpack.c.bf16 %v223_v45, %v222_v44  ;;  %v224_v47 = vld [vmem:[%s692_s5 + $0x30] sm:$0xff]  ;;  %v225_v48 = vld [vmem:[%s692_s5 + $0x38] sm:$0xff]  ;;  %v335_v50 = vld [vmem:[%s691_s4] ss:$0 sm:$0xff]  ;;  %p495_p3 = por %p494_p2, %p493_p1 }
   0xf   :  { %450 = vmatprep.subr.bf16.mxu1 %v512_v3  ;;  %467 = vmatpush3.bf16.msra.mxu0 %v466_v35  ;;  %v475_v49 = vpack.c.bf16 %v225_v48, %v224_v47  ;;  %v337_v60 = vld [vmem:[%s693_s6] ss:$0 sm:$0xff] }
  0x10   :  { %468 = vmatprep.subr.bf16.mxu0 %v512_v3  ;;  %p496_p4 = pnand %p495_p3, %p489_p0 }
  0x12   :  { %452 = vmatpush3.bf16.msra.mxu1 %v451_v20 }
  0x13   :  { %453 = vmatprep.subr.bf16.mxu1 %v512_v3  ;;  %470 = vmatpush3.bf16.msra.mxu0 %v469_v43 }
  0x14   :  { %471 = vmatprep.subr.bf16.mxu0 %v512_v3 }
  0x16   :  { %455 = vmatpush3.bf16.msra.mxu1 %v454_v23 }
  0x17   :  { %456 = vmatprep.subr.bf16.mxu1 %v512_v3  ;;  %473 = vmatpush3.bf16.msra.mxu0 %v472_v46 }
  0x18   :  { %474 = vmatprep.subr.bf16.mxu0 %v512_v3 }
  0x1a   :  { %458 = vmatpush3.bf16.msra.mxu1 %v457_v26 }
  0x1b   :  { %459 = vmatprep.subr.bf16.mxu1 %v512_v3  ;;  %476 = vmatpush3.bf16.msra.mxu0 %v475_v49 }
  0x1e   :  { %461 = vmatpush3.bf16.msra.mxu1 %v460_v29 }
  0x1f   :  { %462 = vmatprep.subr.bf16.mxu1 %v512_v3 }
  0x22   :  { %464 = vmatpush3.bf16.msra.mxu1 %v463_v32 }
  0xde   :  { %v109_v37 = vpop.f32.mrb[0].mxu0 }
  0xdf   :  { %v110_v38 = vadd.f32 %v333_v36, %v109_v37  ;;  %v380_v39 = vpop.f32.mrb[1].mxu0 }
  0xe1   :  { %v113_v40 = vmax.f32 %v110_v38, 0.0 }
  0xe3   :  { %414 = vmatmul.mubr.f32.vlgmr.msra.gmra.mrb[0].mxu1 %v113_v40 }
 0x1b6   :  { %v203_v51 = vpop.f32.mrb[0].mxu1 }
 0x1b7   :  { %v204_v52 = vadd.f32 %v335_v50, %v203_v51  ;;  %v415_v53 = vpop.f32.mrb[1].mxu1 }
 0x1b9   :  { %v214_v54 = vmax.f32 %v204_v52, 0.0  ;;  %310 = vrot.lane.b32.xlu0 %v204_v52, %s515_s11  ;;  %v336_v56 = vmul.f32 -1.442695, %v204_v52 }
 0x1bb   :  { %216 = vst.msk [vmem:[#allocation2] sm:$0xff] %vm215_vm2, %v214_v54  ;;  %482 = vpow2.f32 %v336_v56 }
 0x1c2   :  { %v217_v55 = vld [vmem:[#allocation2] sm:$0xff] }
 0x1c3   :  { %433 = vmatmul.mubr.msk.f32.vlgmr.msra.gmra.mrb[2].mxu0 %vm233_vm3, %v217_v55 }
 0x1c5   :  { %v483_v57 = vpop.eup %482 }
 0x1c6   :  { %v210_v58 = vadd.f32 1.0, %v483_v57 }
 0x1c8   :  { %484 = vrcp.f32 %v210_v58 }
 0x1d2   :  { %v485_v59 = vpop.eup %484 }
 0x1d3   :  { %v307_v0 = vsub.f32 1.0, %v485_v59 }
 0x22b   :  { %v311_v61 = vpop.permute.xlu0 %310 }
 0x22c   :  { %v313_v2 = vmul.f32 %v485_v59, %v311_v61 }
 0x296   :  { %v303_v62 = vpop.f32.mrb[2].mxu0 }
 0x297   :  { %v304_v63 = vadd.f32 %v337_v60, %v303_v62  ;;  %v434_v1 = vpop.f32.mrb[3].mxu0 }
 0x299   :  { %v308_v3 = vmul.f32 %v307_v0, %v304_v63  ;;  %v315_v4 = vmul.f32 1.442695, %v304_v63 }
 0x29b   :  { %v314_v5 = vadd.f32 %v313_v2, %v308_v3  ;;  %486 = vpow2.f32 %v315_v4 }
 0x29d   :  { %317 = vst.msk [vmem:[#allocation3] sm:$0xff] %vm39_vm1, %v314_v5 }
 0x2a5   :  { %v487_v6 = vpop.eup %486 }
 0x2a6   :  { %318 = vst.msk [vmem:[#allocation3] sm:$0xff] %vm215_vm2, %v487_v6 }
 0x2a7   :  { %499 = shalt.err (!%p496_p4)
}
 0x2a8   :  { %s500_s15 = scalar_lea.hbm %s694_s7, 128 }
 0x2a9   :  { %p501_p5 = scmp.ne.s32.totalorder %s694_s7, %s500_s15  ;;  %p504_p6 = scmp.lt.u32.totalorder %s500_s15, %s694_s7 }
 0x2ab   :  { %p506_p7 = pnand %p504_p6, %p501_p5 }
 0x2ad   :  { %509 = shalt.err (!%p506_p7)
}
 0x2ae   :  { %328 = dma.vmem_to_hbm [thread:$0]  %s326_s13, 128, %s694_s7, [#allocation4]  }
 0x2af   :  { %510 = dma.done.wait [#allocation4], 128  }
 0x2b0   :  { %511 = vsyncadd [#allocation4], 4294967168 }
 0x2b1   :  { %332 = vsyncpa [#allocation4], 1 }

</bundles_post_ra>
